<compile_context>
chip_gen: v6e
topology: v6e:2x2x1
jax: 0.10.0
libtpu: 0.0.40
codegen_flags: <defaults>
</compile_context>

<pallas_src>
import functools

import jax
import jax.numpy as jnp
from jax.experimental import pallas as pl
from jax.experimental.pallas import tpu as pltpu

LANE = 128  # TPU vreg lane width


def _pad_to(a, target, axis):
    pad = target - a.shape[axis]
    if pad <= 0:
        return a
    widths = [(0, 0)] * a.ndim
    widths[axis] = (0, pad)
    return jnp.pad(a, widths)


def bpnet_mlp_kernel(x_ref, w1_ref, b1_ref, w2_ref, b2_ref, o_ref):
    # Fused: h = relu(x @ W1 + b1); out = h @ W2 + b2
    # x/W1/W2 arrive as bf16 (MXU path, f32 accumulation); biases are f32 and
    # the elementwise bias-add / ReLU stay in f32 vregs (VPU).
    h = jnp.dot(x_ref[...], w1_ref[...], preferred_element_type=jnp.float32)
    h = jnp.maximum(h + b1_ref[...], 0.0)
    out = jnp.dot(h.astype(jnp.bfloat16), w2_ref[...],
                  preferred_element_type=jnp.float32)
    o_ref[...] = (out + b2_ref[...]).astype(o_ref.dtype)


@functools.partial(jax.jit, static_argnames=("tb",))
def bpnet_forward(x, w1, b1, w2, b2, *, tb=128):
    """x: [B, IN] f32; w1: [IN, HID]; b1: [1, HID]; w2: [HID, OUT]; b2: [1, OUT].

    Weights are stored pre-transposed as [in, out] so the kernel computes
    x @ W + b (== PyTorch's x @ W.T + b with W stored [out, in]).
    """
    B, IN = x.shape
    HID = w1.shape[1]
    OUT = w2.shape[1]

    # Lane-pad every feature dim up to a multiple of 128; pad batch to TB.
    in_p = max(LANE, pl.cdiv(IN, LANE) * LANE)
    hid_p = max(LANE, pl.cdiv(HID, LANE) * LANE)
    out_p = max(LANE, pl.cdiv(OUT, LANE) * LANE)
    b_p = pl.cdiv(B, tb) * tb

    # Zero-padding keeps the math exact: padded input cols hit zero weight
    # rows, padded hidden cols get zero bias -> ReLU(0)=0 -> zero contribution.
    x_p = _pad_to(_pad_to(x, b_p, 0), in_p, 1).astype(jnp.bfloat16)
    w1_p = _pad_to(_pad_to(w1, in_p, 0), hid_p, 1).astype(jnp.bfloat16)
    w2_p = _pad_to(_pad_to(w2, hid_p, 0), out_p, 1).astype(jnp.bfloat16)
    b1_p = _pad_to(b1, hid_p, 1).astype(jnp.float32)
    b2_p = _pad_to(b2, out_p, 1).astype(jnp.float32)

    grid = (b_p // tb,)
    out_padded = pl.pallas_call(
        bpnet_mlp_kernel,
        out_shape=jax.ShapeDtypeStruct((b_p, out_p), jnp.float32),
        grid_spec=pltpu.PrefetchScalarGridSpec(
            num_scalar_prefetch=0,
            grid=grid,
            in_specs=[
                pl.BlockSpec((tb, in_p), lambda i: (i, 0)),      # streamed acts
                pl.BlockSpec((in_p, hid_p), lambda i: (0, 0)),   # resident W1
                pl.BlockSpec((1, hid_p), lambda i: (0, 0)),      # resident b1
                pl.BlockSpec((hid_p, out_p), lambda i: (0, 0)),  # resident W2
                pl.BlockSpec((1, out_p), lambda i: (0, 0)),      # resident b2
            ],
            out_specs=pl.BlockSpec((tb, out_p), lambda i: (i, 0)),
        ),
        compiler_params=pltpu.CompilerParams(
            # v7x: shard the batch axis across its 2 TensorCores; harmless on
            # v5e/v6e (single TC).
            dimension_semantics=("parallel",),
        ),
    )(x_p, w1_p, b1_p, w2_p, b2_p)

    # Slice the lane-padded output back to the logical shape.
    return out_padded[:B, :OUT]


def reference_forward(x, w1, b1, w2, b2):
    h = jnp.maximum(x @ w1 + b1, 0.0)
    return h @ w2 + b2


if __name__ == "__main__":
    # Small logical feature sizes consistent with the wrapped MLP; batch large
    # enough (multiple of TB=128) to actually exercise the grid-over-batch
    # streaming path.
    B, IN, HID, OUT = 256, 32, 64, 10

    key = jax.random.PRNGKey(0)
    kx, kw1, kb1, kw2, kb2 = jax.random.split(key, 5)

    x = jax.random.normal(kx, (B, IN), dtype=jnp.float32)
    # Deterministic Kaiming-ish init, stored as [in, out].
    w1 = jax.random.normal(kw1, (IN, HID), dtype=jnp.float32) * (1.0 / jnp.sqrt(IN))
    b1 = jax.random.normal(kb1, (1, HID), dtype=jnp.float32) * 0.01
    w2 = jax.random.normal(kw2, (HID, OUT), dtype=jnp.float32) * (1.0 / jnp.sqrt(HID))
    b2 = jax.random.normal(kb2, (1, OUT), dtype=jnp.float32) * 0.01

    out = bpnet_forward(x, w1, b1, w2, b2)
    out = jax.block_until_ready(out)

    ref = reference_forward(x, w1, b1, w2, b2)
    assert out.shape == (B, OUT), out.shape
    # bf16 MXU operands with f32 accumulation -> loose tolerance vs f32 ref.
    assert jnp.allclose(out, ref, atol=1e-1, rtol=1e-1), (
        float(jnp.max(jnp.abs(out - ref))))

    print("KERNEL_OK")
</pallas_src>

<mosaic_0001>
module attributes {stable_mosaic.version = 11 : i64} {
  func.func @bpnet_mlp_kernel(%arg0: i32, %arg1: memref<128x128xbf16, #tpu.memory_space<vmem>>, %arg2: memref<128x128xbf16, #tpu.memory_space<vmem>>, %arg3: memref<1x128xf32, #tpu.memory_space<vmem>>, %arg4: memref<128x128xbf16, #tpu.memory_space<vmem>>, %arg5: memref<1x128xf32, #tpu.memory_space<vmem>>, %arg6: memref<128x128xf32, #tpu.memory_space<vmem>>) attributes {dimension_semantics = [#tpu.dimension_semantics<parallel>], iteration_bounds = array<i64: 2>, scalar_prefetch = 0 : i64, scratch_operands = 0 : i64, tpu.core_type = #tpu.core_type<tc>, window_params = [{transform_indices = @transform_0, window_bounds = array<i64: 128, 128>}, {pipeline_mode = #tpu.pipeline_mode<synchronous>, transform_indices = @transform_1, window_bounds = array<i64: 128, 128>}, {pipeline_mode = #tpu.pipeline_mode<synchronous>, transform_indices = @transform_2, window_bounds = array<i64: 1, 128>}, {pipeline_mode = #tpu.pipeline_mode<synchronous>, transform_indices = @transform_3, window_bounds = array<i64: 128, 128>}, {pipeline_mode = #tpu.pipeline_mode<synchronous>, transform_indices = @transform_4, window_bounds = array<i64: 1, 128>}, {transform_indices = @transform_5, window_bounds = array<i64: 128, 128>}]} {
    %c0 = arith.constant 0 : index
    %c0_0 = arith.constant 0 : index
    %0 = vector.load %arg1[%c0, %c0_0] : memref<128x128xbf16, #tpu.memory_space<vmem>>, vector<128x128xbf16>
    %c0_1 = arith.constant 0 : index
    %c0_2 = arith.constant 0 : index
    %1 = vector.load %arg2[%c0_1, %c0_2] : memref<128x128xbf16, #tpu.memory_space<vmem>>, vector<128x128xbf16>
    %cst = arith.constant dense<0.000000e+00> : vector<128x128xf32>
    %2 = tpu.matmul %0, %1, %cst {dimension_numbers = #tpu.dot_dimension_numbers<[1], [0], [0], [1], [0, 0, 1, 1], [], []>} : vector<128x128xbf16>, vector<128x128xbf16>, vector<128x128xf32> -> vector<128x128xf32>
    %c0_3 = arith.constant 0 : index
    %c0_4 = arith.constant 0 : index
    %3 = vector.load %arg3[%c0_3, %c0_4] : memref<1x128xf32, #tpu.memory_space<vmem>>, vector<1x128xf32>
    %4 = vector.broadcast %3 : vector<1x128xf32> to vector<128x128xf32>
    %5 = arith.addf %2, %4 : vector<128x128xf32>
    %cst_5 = arith.constant 0.000000e+00 : f32
    %6 = vector.broadcast %cst_5 : f32 to vector<128x128xf32>
    %7 = arith.maximumf %5, %6 : vector<128x128xf32>
    %8 = arith.truncf %7 : vector<128x128xf32> to vector<128x128xbf16>
    %c0_6 = arith.constant 0 : index
    %c0_7 = arith.constant 0 : index
    %9 = vector.load %arg4[%c0_6, %c0_7] : memref<128x128xbf16, #tpu.memory_space<vmem>>, vector<128x128xbf16>
    %cst_8 = arith.constant dense<0.000000e+00> : vector<128x128xf32>
    %10 = tpu.matmul %8, %9, %cst_8 {dimension_numbers = #tpu.dot_dimension_numbers<[1], [0], [0], [1], [0, 0, 1, 1], [], []>} : vector<128x128xbf16>, vector<128x128xbf16>, vector<128x128xf32> -> vector<128x128xf32>
    %c0_9 = arith.constant 0 : index
    %c0_10 = arith.constant 0 : index
    %11 = vector.load %arg5[%c0_9, %c0_10] : memref<1x128xf32, #tpu.memory_space<vmem>>, vector<1x128xf32>
    %12 = vector.broadcast %11 : vector<1x128xf32> to vector<128x128xf32>
    %13 = arith.addf %10, %12 : vector<128x128xf32>
    %c0_11 = arith.constant 0 : index
    %c0_12 = arith.constant 0 : index
    %14 = vector.load %arg6[%c0_11, %c0_12] : memref<128x128xf32, #tpu.memory_space<vmem>>, vector<128x128xf32>
    tpu.vector_store %arg6[%c0_11, %c0_12], %13 {strides = array<i32>} : memref<128x128xf32, #tpu.memory_space<vmem>>, vector<128x128xf32>,
    return
  }
  func.func @transform_0(%arg0: i32) -> (i32, i32) {
    %c0_i32 = arith.constant 0 : i32
    %c0_i32_0 = arith.constant 0 : i32
    return %arg0, %c0_i32 : i32, i32
  }
  func.func @transform_1(%arg0: i32) -> (i32, i32) {
    %c0_i32 = arith.constant 0 : i32
    %c0_i32_0 = arith.constant 0 : i32
    %c0_i32_1 = arith.constant 0 : i32
    return %c0_i32, %c0_i32_0 : i32, i32
  }
  func.func @transform_2(%arg0: i32) -> (i32, i32) {
    %c0_i32 = arith.constant 0 : i32
    %c0_i32_0 = arith.constant 0 : i32
    %c0_i32_1 = arith.constant 0 : i32
    return %c0_i32, %c0_i32_0 : i32, i32
  }
  func.func @transform_3(%arg0: i32) -> (i32, i32) {
    %c0_i32 = arith.constant 0 : i32
    %c0_i32_0 = arith.constant 0 : i32
    %c0_i32_1 = arith.constant 0 : i32
    return %c0_i32, %c0_i32_0 : i32, i32
  }
  func.func @transform_4(%arg0: i32) -> (i32, i32) {
    %c0_i32 = arith.constant 0 : i32
    %c0_i32_0 = arith.constant 0 : i32
    %c0_i32_1 = arith.constant 0 : i32
    return %c0_i32, %c0_i32_0 : i32, i32
  }
  func.func @transform_5(%arg0: i32) -> (i32, i32) {
    %c0_i32 = arith.constant 0 : i32
    %c0_i32_0 = arith.constant 0 : i32
    return %arg0, %c0_i32 : i32, i32
  }
}

</mosaic_0001>

<bundles_post_ra>
// kernel: bpnet_forward.1
= control target key start
LH: loop header
LB: loop body
LE: loop exit
PB: predicated region body
PF: predicated region fallthrough
CT: control target
= control target key end

     0   :  { %s928_s18 = smov 0   ;;  %s1031_s0 = inlined_call_operand.vmem [shape: bf16[256,128], index: 0, kind: input, shape index: {}]   ;;  %s1032_s1 = inlined_call_operand.vmem [shape: bf16[128,128], index: 1, kind: input, shape index: {}]   ;;  %s1033_s2 = inlined_call_operand.vmem [shape: f32[1,128], index: 2, kind: input, shape index: {}]   ;;  %s1034_s3 = inlined_call_operand.vmem [shape: bf16[128,128], index: 3, kind: input, shape index: {}]   ;;  %s1035_s4 = inlined_call_operand.vmem [shape: f32[1,128], index: 4, kind: input, shape index: {}]   ;;  %s1036_s5 = inlined_call_operand.vmem [shape: f32[256,128], index: 5, kind: output, shape index: {}]  }
   0x1 LB: > { %s725_s19 = sadd.s32 4294967295, %s896_s18   ;;  %p729_p0 = scmp.ge.s32.totalorder %s896_s18, 1  ;;  %s896_s18 = sphi %s928_s18, %s15_s18  }
   0x2   : > { %p188_p1 = scmp.lt.s32.totalorder %s896_s18, 3 }
   0x4   : > { %p189_p2 = pnand %p729_p0, %p188_p1 }
   0x5   : > { %s730_s22 = sshll.u32 (!%p189_p2), %s725_s19, 4 }
   0x6   : > { %192 = sbr.rel (%p189_p2) target bundleno = 476 (0x1dc), region = 40  ;;  %p217_p3 = scmp.lt.s32.totalorder (!%p189_p2), %s730_s22, 31 }
   0xb   : > { %v866_v0 = vld [vmem:[%s1032_s1 + $0x38] sm:$0xff]   ;;  %v867_v1 = vld [vmem:[%s1032_s1 + $0x30] sm:$0xff]   ;;  %s1038_s22 = smov (!%p217_p3, %s730_s22), 31  ;;  %v868_v2 = vld [vmem:[%s1032_s1 + $0x28] sm:$0xff]  }
   0xc   : > { %794 = vmatprep.subr.bf16.mxu0 %v866_v0  ;;  %s731_s27 = sshll.u32 %s1038_s22, 2  ;;  %v869_v3 = vld [vmem:[%s1032_s1 + $0x20] sm:$0xff]   ;;  %v870_v5 = vld [vmem:[%s1032_s1 + $0x18] sm:$0xff]   ;;  %v871_v6 = vld [vmem:[%s1032_s1 + $0x10] sm:$0xff]   ;;  %s733_s11 = sshll.u32 %s1038_s22, 3 }
   0xd   : > { %795 = vmatpush3.bf16.msra.mxu0 %v866_v0  ;;  %s951_s30 = scalar_lea.vmem %s1031_s0, %s731_s27  ;;  %v882_v7 = vld [vmem:[%s1034_s3 + $0x38] sm:$0xff]   ;;  %v883_v8 = vld [vmem:[%s1034_s3 + $0x30] sm:$0xff]   ;;  %v872_v9 = vld [vmem:[%s1032_s1 + $0x8] sm:$0xff]   ;;  %s1010_s16 = scalar_lea.vmem %s1036_s5, %s733_s11 }
   0xe   : > { %796 = vmatprep.subr.bf16.mxu0 %v867_v1  ;;  %v874_v4 = vld [vmem:[%s951_s30] sm:$0xff]   ;;  %826 = vmatprep.subr.bf16.mxu1 %v882_v7  ;;  %v884_v10 = vld [vmem:[%s1034_s3 + $0x28] sm:$0xff]   ;;  %v886_v13 = vld [vmem:[%s1034_s3 + $0x18] sm:$0xff]  }
   0xf   : > { %810 = vmatprep.mubr.bf16.mxu0 %v874_v4  ;;  %827 = vmatpush3.bf16.msra.mxu1 %v882_v7  ;;  %v873_v11 = vld [vmem:[%s1032_s1] sm:$0xff]   ;;  %v875_v14 = vld [vmem:[%s951_s30 + $0x8] sm:$0xff]   ;;  %v876_v15 = vld [vmem:[%s951_s30 + $0x10] sm:$0xff]  }
  0x10   : > { %828 = vmatprep.subr.bf16.mxu1 %v883_v8  ;;  %v885_v12 = vld [vmem:[%s1034_s3 + $0x20] sm:$0xff]   ;;  %v877_v16 = vld [vmem:[%s951_s30 + $0x18] sm:$0xff]   ;;  %v879_v18 = vld [vmem:[%s951_s30 + $0x28] sm:$0xff]  }
  0x11   : > { %797 = vmatpush3.bf16.msra.mxu0 %v867_v1  ;;  %v878_v17 = vld [vmem:[%s951_s30 + $0x20] sm:$0xff]   ;;  %v880_v19 = vld [vmem:[%s951_s30 + $0x30] sm:$0xff]   ;;  %v881_v20 = vld [vmem:[%s951_s30 + $0x38] sm:$0xff]  }
  0x12   : > { %798 = vmatprep.subr.bf16.mxu0 %v868_v2  ;;  %v887_v21 = vld [vmem:[%s1034_s3 + $0x10] sm:$0xff]   ;;  %v888_v22 = vld [vmem:[%s1034_s3 + $0x8] sm:$0xff]   ;;  %v889_v23 = vld [vmem:[%s1034_s3] sm:$0xff]  }
  0x13   : > { %829 = vmatpush3.bf16.msra.mxu1 %v883_v8  ;;  %v734_v26 = vld [vmem:[%s1033_s2] ss:$0 sm:$0xff] }
  0x14   : > { %830 = vmatprep.subr.bf16.mxu1 %v884_v10 }
  0x15   : > { %799 = vmatpush3.bf16.msra.mxu0 %v868_v2 }
  0x16   : > { %800 = vmatprep.subr.bf16.mxu0 %v869_v3 }
  0x17   : > { %831 = vmatpush3.bf16.msra.mxu1 %v884_v10 }
  0x18   : > { %832 = vmatprep.subr.bf16.mxu1 %v885_v12 }
  0x19   : > { %801 = vmatpush3.bf16.msra.mxu0 %v869_v3 }
  0x1a   : > { %802 = vmatprep.subr.bf16.mxu0 %v870_v5 }
  0x1b   : > { %833 = vmatpush3.bf16.msra.mxu1 %v885_v12 }
  0x1c   : > { %834 = vmatprep.subr.bf16.mxu1 %v886_v13 }
  0x1d   : > { %803 = vmatpush3.bf16.msra.mxu0 %v870_v5 }
  0x1e   : > { %804 = vmatprep.subr.bf16.mxu0 %v871_v6 }
  0x1f   : > { %835 = vmatpush3.bf16.msra.mxu1 %v886_v13 }
  0x20   : > { %836 = vmatprep.subr.bf16.mxu1 %v887_v21 }
  0x21   : > { %805 = vmatpush3.bf16.msra.mxu0 %v871_v6 }
  0x22   : > { %806 = vmatprep.subr.bf16.mxu0 %v872_v9 }
  0x23   : > { %837 = vmatpush3.bf16.msra.mxu1 %v887_v21 }
  0x24   : > { %838 = vmatprep.subr.bf16.mxu1 %v888_v22 }
  0x25   : > { %807 = vmatpush3.bf16.msra.mxu0 %v872_v9 }
  0x26   : > { %808 = vmatprep.subr.bf16.mxu0 %v873_v11 }
  0x27   : > { %839 = vmatpush3.bf16.msra.mxu1 %v888_v22 }
  0x28   : > { %840 = vmatprep.subr.bf16.mxu1 %v889_v23 }
  0x29   : > { %809 = vmatpush3.bf16.msra.mxu0 %v873_v11 }
  0x2b   : > { %841 = vmatpush3.bf16.msra.mxu1 %v889_v23 }
  0x2c   : > { %811 = vmatmul.mubr.bf16.vlgmr.msra.gmra.mxu0 %v875_v14 }
  0x2d   : > { %814 = vmatprep.mubr.bf16.mxu0 %v876_v15 }
  0x34   : > { %815 = vmatmul.mubr.bf16.gmra.mxu0 %v877_v16 }
  0x35   : > { %818 = vmatprep.mubr.bf16.mxu0 %v878_v17  ;;  %v751_v17 = vld [vmem:[%s1035_s4] ss:$0 sm:$0xff] }
  0x3c   : > { %819 = vmatmul.mubr.bf16.gmra.mxu0 %v879_v18 }
  0x3d   : > { %822 = vmatprep.mubr.bf16.mxu0 %v880_v19 }
  0x44   : > { %823 = vmatmul.mubr.bf16.gmra.mxu0 %v881_v20 }
  0xec   : > { %v812_v24 = vpop.f32.mrf.mxu0 }
  0xed   : > { %v407_v30 = vadd.f32 %v812_v24, %v734_v26 }
  0xee   : > { %v398_v25 = vpop.f32.mrf.mxu0 }
  0xef   : > { %v399_v28 = vadd.f32 %v734_v26, %v398_v25  ;;  %v463_v37 = vmax.f32 %v407_v30, 0.0 }
  0xf0   : > { %v813_v27 = vpop.f32.mrf.mxu0 }
  0xf1   : > { %v410_v29 = vadd.f32 %v813_v27, %v734_v26  ;;  %v461_v35 = vmax.f32 %v399_v28, 0.0 }
  0xf2   : > { %v401_v31 = vpop.f32.mrf.mxu0 }
  0xf3   : > { %v402_v32 = vadd.f32 %v734_v26, %v401_v31  ;;  %v464_v33 = vmax.f32 %v410_v29, 0.0 }
  0xf4   : > { %v816_v34 = vpop.f32.mrf.mxu0 }
  0xf5   : > { %v462_v36 = vmax.f32 %v402_v32, 0.0  ;;  %v478_v40 = vpack.c.bf16 %v464_v33, %v463_v37  ;;  %v423_v44 = vadd.f32 %v816_v34, %v734_v26 }
  0xf6   : > { %v414_v38 = vpop.f32.mrf.mxu0 }
  0xf7   : > { %v477_v39 = vpack.c.bf16 %v462_v36, %v461_v35  ;;  %v415_v42 = vadd.f32 %v734_v26, %v414_v38  ;;  %v467_v51 = vmax.f32 %v423_v44, 0.0 }
  0xf8   : > { %v817_v41 = vpop.f32.mrf.mxu0 }
  0xf9   : > { %v426_v43 = vadd.f32 %v817_v41, %v734_v26  ;;  %842 = vmatprep.mubr.bf16.mxu1 %v477_v39  ;;  %v465_v49 = vmax.f32 %v415_v42, 0.0 }
  0xfa   : > { %v417_v45 = vpop.f32.mrf.mxu0  ;;  %843 = vmatmul.mubr.bf16.vlgmr.msra.gmra.mxu1 %v478_v40 }
  0xfb   : > { %v418_v46 = vadd.f32 %v734_v26, %v417_v45  ;;  %v468_v47 = vmax.f32 %v426_v43, 0.0 }
  0xfc   : > { %v820_v48 = vpop.f32.mrf.mxu0 }
  0xfd   : > { %v466_v50 = vmax.f32 %v418_v46, 0.0  ;;  %v480_v54 = vpack.c.bf16 %v468_v47, %v467_v51  ;;  %v439_v58 = vadd.f32 %v820_v48, %v734_v26 }
  0xfe   : > { %v430_v52 = vpop.f32.mrf.mxu0 }
  0xff   : > { %v479_v53 = vpack.c.bf16 %v466_v50, %v465_v49  ;;  %v431_v56 = vadd.f32 %v734_v26, %v430_v52  ;;  %v471_v1 = vmax.f32 %v439_v58, 0.0 }
 0x100   : > { %v821_v55 = vpop.f32.mrf.mxu0 }
 0x101   : > { %v442_v57 = vadd.f32 %v821_v55, %v734_v26  ;;  %846 = vmatprep.mubr.bf16.mxu1 %v479_v53  ;;  %v469_v63 = vmax.f32 %v431_v56, 0.0 }
 0x102   : > { %v433_v59 = vpop.f32.mrf.mxu0  ;;  %847 = vmatmul.mubr.bf16.gmra.mxu1 %v480_v54 }
 0x103   : > { %v434_v60 = vadd.f32 %v734_v26, %v433_v59  ;;  %v472_v61 = vmax.f32 %v442_v57, 0.0 }
 0x104   : > { %v824_v62 = vpop.f32.mrf.mxu0 }
 0x105   : > { %v470_v0 = vmax.f32 %v434_v60, 0.0  ;;  %v482_v4 = vpack.c.bf16 %v472_v61, %v471_v1  ;;  %v455_v8 = vadd.f32 %v824_v62, %v734_v26 }
 0x106   : > { %v446_v2 = vpop.f32.mrf.mxu0 }
 0x107   : > { %v481_v3 = vpack.c.bf16 %v470_v0, %v469_v63  ;;  %v447_v6 = vadd.f32 %v734_v26, %v446_v2  ;;  %v475_v14 = vmax.f32 %v455_v8, 0.0 }
 0x108   : > { %v825_v5 = vpop.f32.mrf.mxu0 }
 0x109   : > { %v458_v7 = vadd.f32 %v825_v5, %v734_v26  ;;  %850 = vmatprep.mubr.bf16.mxu1 %v481_v3  ;;  %v473_v12 = vmax.f32 %v447_v6, 0.0 }
 0x10a   : > { %v449_v9 = vpop.f32.mrf.mxu0  ;;  %851 = vmatmul.mubr.bf16.gmra.mxu1 %v482_v4 }
 0x10b   : > { %v450_v10 = vadd.f32 %v734_v26, %v449_v9  ;;  %v476_v11 = vmax.f32 %v458_v7, 0.0 }
 0x10d   : > { %v474_v13 = vmax.f32 %v450_v10, 0.0  ;;  %v484_v16 = vpack.c.bf16 %v476_v11, %v475_v14 }
 0x10f   : > { %v483_v15 = vpack.c.bf16 %v474_v13, %v473_v12 }
 0x111   : > { %854 = vmatprep.mubr.bf16.mxu1 %v483_v15 }
 0x112   : > { %855 = vmatmul.mubr.bf16.gmra.mxu1 %v484_v16 }
 0x1ba   : > { %v844_v18 = vpop.f32.mrf.mxu1 }
 0x1bb   : > { %v599_v19 = vadd.f32 %v844_v18, %v751_v17 }
 0x1bc   : > { %v590_v20 = vpop.f32.mrf.mxu1 }
 0x1bd   : > { %655 = vst [vmem:[%s1010_s16 + $0x10] sm:$0xff] %v599_v19  ;;  %v591_v21 = vadd.f32 %v751_v17, %v590_v20 }
 0x1be   : > { %v845_v22 = vpop.f32.mrf.mxu1 }
 0x1bf   : > { %653 = vst [vmem:[%s1010_s16] sm:$0xff] %v591_v21  ;;  %v602_v23 = vadd.f32 %v845_v22, %v751_v17 }
 0x1c0   : > { %v593_v24 = vpop.f32.mrf.mxu1 }
 0x1c1   : > { %656 = vst [vmem:[%s1010_s16 + $0x18] sm:$0xff] %v602_v23  ;;  %v594_v25 = vadd.f32 %v751_v17, %v593_v24 }
 0x1c2   : > { %v848_v26 = vpop.f32.mrf.mxu1 }
 0x1c3   : > { %654 = vst [vmem:[%s1010_s16 + $0x8] sm:$0xff] %v594_v25  ;;  %v615_v27 = vadd.f32 %v848_v26, %v751_v17 }
 0x1c4   : > { %v606_v28 = vpop.f32.mrf.mxu1 }
 0x1c5   : > { %659 = vst [vmem:[%s1010_s16 + $0x30] sm:$0xff] %v615_v27  ;;  %v607_v29 = vadd.f32 %v751_v17, %v606_v28 }
 0x1c6   : > { %v849_v30 = vpop.f32.mrf.mxu1 }
 0x1c7   : > { %657 = vst [vmem:[%s1010_s16 + $0x20] sm:$0xff] %v607_v29  ;;  %v618_v31 = vadd.f32 %v849_v30, %v751_v17 }
 0x1c8   : > { %v609_v32 = vpop.f32.mrf.mxu1 }
 0x1c9   : > { %660 = vst [vmem:[%s1010_s16 + $0x38] sm:$0xff] %v618_v31  ;;  %v610_v33 = vadd.f32 %v751_v17, %v609_v32 }
 0x1ca   : > { %v852_v34 = vpop.f32.mrf.mxu1 }
 0x1cb   : > { %658 = vst [vmem:[%s1010_s16 + $0x28] sm:$0xff] %v610_v33  ;;  %v631_v35 = vadd.f32 %v852_v34, %v751_v17 }
 0x1cc   : > { %v622_v36 = vpop.f32.mrf.mxu1 }
 0x1cd   : > { %663 = vst [vmem:[%s1010_s16 + $0x50] sm:$0xff] %v631_v35  ;;  %v623_v37 = vadd.f32 %v751_v17, %v622_v36 }
 0x1ce   : > { %v853_v38 = vpop.f32.mrf.mxu1 }
 0x1cf   : > { %661 = vst [vmem:[%s1010_s16 + $0x40] sm:$0xff] %v623_v37  ;;  %v634_v39 = vadd.f32 %v853_v38, %v751_v17 }
 0x1d0   : > { %v625_v40 = vpop.f32.mrf.mxu1 }
 0x1d1   : > { %664 = vst [vmem:[%s1010_s16 + $0x58] sm:$0xff] %v634_v39  ;;  %v626_v41 = vadd.f32 %v751_v17, %v625_v40 }
 0x1d2   : > { %v856_v42 = vpop.f32.mrf.mxu1 }
 0x1d3   : > { %662 = vst [vmem:[%s1010_s16 + $0x48] sm:$0xff] %v626_v41  ;;  %v647_v43 = vadd.f32 %v856_v42, %v751_v17 }
 0x1d4   : > { %v638_v44 = vpop.f32.mrf.mxu1 }
 0x1d5   : > { %667 = vst [vmem:[%s1010_s16 + $0x70] sm:$0xff] %v647_v43  ;;  %v639_v45 = vadd.f32 %v751_v17, %v638_v44 }
 0x1d6   : > { %v857_v46 = vpop.f32.mrf.mxu1 }
 0x1d7   : > { %665 = vst [vmem:[%s1010_s16 + $0x60] sm:$0xff] %v639_v45  ;;  %v650_v47 = vadd.f32 %v857_v46, %v751_v17 }
 0x1d8   : > { %v641_v48 = vpop.f32.mrf.mxu1 }
 0x1d9   : > { %668 = vst [vmem:[%s1010_s16 + $0x78] sm:$0xff] %v650_v47  ;;  %v642_v49 = vadd.f32 %v751_v17, %v641_v48 }
 0x1db   : > { %666 = vst [vmem:[%s1010_s16 + $0x68] sm:$0xff] %v642_v49 }
 0x1dc PF: > { %s15_s18 = sadd.s32 1, %s896_s18  }
 0x1dd   : > { %p12_p4 = scmp.ge.s32.totalorder %s15_s18, 4  }
 0x1df   :  { %14 = sbr.rel (!%p12_p4) target bundleno = 1 (0x1), region = 70 }

</bundles_post_ra>
